<compile_context>
chip_gen: v5e
topology: v5e:2x2
jax: 0.10.0
libtpu: 0.0.40
codegen_flags: <defaults>
</compile_context>

<pallas_src>
import jax
import jax.numpy as jnp
from jax.experimental import pallas as pl
from jax.experimental.pallas import tpu as pltpu


# ---------------------------------------------------------------------------
# Fused kernel: base MLP -> in-kernel weight slicing -> generated classifier
# ---------------------------------------------------------------------------

def _scatter_cols(cols, width):
    """Place each (B,1) column value at its lane: [(B,1)]*width -> (B,width).

    Built from iota/compare/select/add only (robust on Mosaic; avoids
    unaligned lane-concatenation).
    """
    lane = jax.lax.broadcasted_iota(jnp.int32, (1, width), 1)
    out = jnp.where(lane == 0, cols[0], 0.0)
    for o in range(1, width):
        out = out + jnp.where(lane == o, cols[o], 0.0)
    return out


def _hyper_kernel(x_ref, num_ref, w1_ref, b1_ref, w2_ref, b2_ref,
                  logits_ref, base_ref):
    f32 = jnp.float32

    # ---- BaseNetwork: (1,S) -> (1,H) -> (1,152), ReLU hidden (MXU matmuls) ----
    h = jnp.dot(x_ref[...], w1_ref[...], preferred_element_type=f32)
    h = jnp.maximum(h + b1_ref[...], 0.0)
    v = jnp.dot(h, w2_ref[...], preferred_element_type=f32) + b2_ref[...]   # (1,152)
    base_ref[...] = v.astype(base_ref.dtype)

    # ---- slice generated classifier params directly from the in-vreg vector ----
    # PyTorch layout: fc1.w = v[0:10]  (10,1);  fc1.b = v[10:20]
    #                 fc2.w = v[20:120] (10,10, row-major out,in); fc2.b = v[120:130]
    #                 fc3.w = v[130:150] (2,10);                   fc3.b = v[150:152]
    fc1w = v[:, 0:10]        # (1,10): fc1 weight column as a lane row
    fc1b = v[:, 10:20]       # (1,10)
    fc2b = v[:, 120:130]     # (1,10)
    fc3w0 = v[:, 130:140]    # (1,10): fc3 row o=0
    fc3w1 = v[:, 140:150]    # (1,10): fc3 row o=1
    fc3b = v[:, 150:152]     # (1,2)

    num = num_ref[...]                                   # (B,1)
    B = num.shape[0]

    # fc1 (K=1): pure VPU broadcast outer product  y1[b,o] = num[b]*v[o] + v[10+o]
    y1 = jnp.maximum(num * fc1w + fc1b, 0.0)             # (B,10)

    # fc2: y2[b,o] = sum_i y1[b,i] * W2[o,i] + fc2b[o]
    # Row o of W2 is the contiguous lane slice v[20+10o : 30+10o], so each output
    # column is a VPU multiply + lane-reduce; columns are recombined with a
    # one-hot lane mask (no transpose / reshape / concat needed).
    cols = []
    for o in range(10):
        w_row = v[:, 20 + o * 10: 30 + o * 10]           # (1,10)
        cols.append(jnp.sum(y1 * w_row, axis=1, keepdims=True))   # (B,1)
    y2 = jnp.maximum(_scatter_cols(cols, 10) + fc2b, 0.0)          # (B,10)

    # fc3 (N=2): two multiply-reduce columns
    l0 = jnp.sum(y2 * fc3w0, axis=1, keepdims=True)      # (B,1)
    l1 = jnp.sum(y2 * fc3w1, axis=1, keepdims=True)      # (B,1)
    logits = _scatter_cols([l0, l1], 2) + fc3b           # (B,2)
    logits_ref[...] = logits.astype(logits_ref.dtype)

    del B  # (shapes are static; nothing else needed)


_VMEM = pl.BlockSpec(memory_space=pltpu.MemorySpace.VMEM)


def hypernetwork_forward(params, x, number):
    """x: (1, start_size) base-net input; number: (B, 1) classifier input.

    Returns (logits (B,2), base_out (1,152)).  The PyTorch module returns
    (classifier(number), optim); the Adam optimizer has no forward-compute
    equivalent, and base_out is returned for parity with `self.x`.
    """
    B = number.shape[0]
    logits, base_out = pl.pallas_call(
        _hyper_kernel,
        out_shape=(jax.ShapeDtypeStruct((B, 2), jnp.float32),
                   jax.ShapeDtypeStruct((1, 152), jnp.float32)),
        in_specs=[_VMEM] * 6,
        out_specs=(_VMEM, _VMEM),
    )(x, number, params["w1"], params["b1"], params["w2"], params["b2"])
    return logits, base_out


# ---------------------------------------------------------------------------
# Deterministic parameter init + smoke test
# ---------------------------------------------------------------------------

def init_params(key, start_size, hidden):
    k1, k2, k3, k4 = jax.random.split(key, 4)
    return {
        "w1": jax.random.normal(k1, (start_size, hidden), jnp.float32) * 0.1,
        "b1": jax.random.normal(k2, (1, hidden), jnp.float32) * 0.01,
        "w2": jax.random.normal(k3, (hidden, 152), jnp.float32) * 0.1,
        "b2": jax.random.normal(k4, (1, 152), jnp.float32) * 0.01,
    }


if __name__ == "__main__":
    start_size = 32
    hidden = 64
    batch = 2

    root = jax.random.PRNGKey(0)
    kp, kx, kn = jax.random.split(root, 3)

    params = init_params(kp, start_size, hidden)
    x = jax.random.normal(kx, (1, start_size), jnp.float32)   # base-net input
    number = jax.random.normal(kn, (batch, 1), jnp.float32)   # classifier input

    logits, base_out = jax.jit(hypernetwork_forward)(params, x, number)
    jax.block_until_ready((logits, base_out))

    assert logits.shape == (batch, 2)
    assert base_out.shape == (1, 152)
    print("KERNEL_OK")
</pallas_src>

<mosaic_0001>
module attributes {stable_mosaic.version = 11 : i64} {
  func.func @_hyper_kernel(%arg0: memref<1x32xf32, #tpu.memory_space<vmem>>, %arg1: memref<2x1xf32, #tpu.memory_space<vmem>>, %arg2: memref<32x64xf32, #tpu.memory_space<vmem>>, %arg3: memref<1x64xf32, #tpu.memory_space<vmem>>, %arg4: memref<64x152xf32, #tpu.memory_space<vmem>>, %arg5: memref<1x152xf32, #tpu.memory_space<vmem>>, %arg6: memref<2x2xf32, #tpu.memory_space<vmem>>, %arg7: memref<1x152xf32, #tpu.memory_space<vmem>>) attributes {dimension_semantics = [], scalar_prefetch = 0 : i64, scratch_operands = 0 : i64, tpu.core_type = #tpu.core_type<tc>} {
    %c0 = arith.constant 0 : index
    %c0_0 = arith.constant 0 : index
    %0 = vector.load %arg0[%c0, %c0_0] : memref<1x32xf32, #tpu.memory_space<vmem>>, vector<1x32xf32>
    %c0_1 = arith.constant 0 : index
    %c0_2 = arith.constant 0 : index
    %1 = vector.load %arg2[%c0_1, %c0_2] : memref<32x64xf32, #tpu.memory_space<vmem>>, vector<32x64xf32>
    %cst = arith.constant dense<0.000000e+00> : vector<1x64xf32>
    %2 = tpu.matmul %0, %1, %cst {dimension_numbers = #tpu.dot_dimension_numbers<[1], [0], [0], [1], [0, 0, 1, 1], [], []>} : vector<1x32xf32>, vector<32x64xf32>, vector<1x64xf32> -> vector<1x64xf32>
    %c0_3 = arith.constant 0 : index
    %c0_4 = arith.constant 0 : index
    %3 = vector.load %arg3[%c0_3, %c0_4] : memref<1x64xf32, #tpu.memory_space<vmem>>, vector<1x64xf32>
    %4 = arith.addf %2, %3 : vector<1x64xf32>
    %cst_5 = arith.constant 0.000000e+00 : f32
    %5 = vector.broadcast %cst_5 : f32 to vector<1x64xf32>
    %6 = arith.maximumf %4, %5 : vector<1x64xf32>
    %c0_6 = arith.constant 0 : index
    %c0_7 = arith.constant 0 : index
    %7 = vector.load %arg4[%c0_6, %c0_7] : memref<64x152xf32, #tpu.memory_space<vmem>>, vector<64x152xf32>
    %cst_8 = arith.constant dense<0.000000e+00> : vector<1x152xf32>
    %8 = tpu.matmul %6, %7, %cst_8 {dimension_numbers = #tpu.dot_dimension_numbers<[1], [0], [0], [1], [0, 0, 1, 1], [], []>} : vector<1x64xf32>, vector<64x152xf32>, vector<1x152xf32> -> vector<1x152xf32>
    %c0_9 = arith.constant 0 : index
    %c0_10 = arith.constant 0 : index
    %9 = vector.load %arg5[%c0_9, %c0_10] : memref<1x152xf32, #tpu.memory_space<vmem>>, vector<1x152xf32>
    %10 = arith.addf %8, %9 : vector<1x152xf32>
    %c0_11 = arith.constant 0 : index
    %c0_12 = arith.constant 0 : index
    %11 = vector.load %arg7[%c0_11, %c0_12] : memref<1x152xf32, #tpu.memory_space<vmem>>, vector<1x152xf32>
    tpu.vector_store %arg7[%c0_11, %c0_12], %10 {strides = array<i32>} : memref<1x152xf32, #tpu.memory_space<vmem>>, vector<1x152xf32>,
    %12 = vector.extract_strided_slice %10 {offsets = [0, 0], sizes = [1, 10], strides = [1, 1]} : vector<1x152xf32> to vector<1x10xf32>
    %13 = vector.extract_strided_slice %10 {offsets = [0, 10], sizes = [1, 10], strides = [1, 1]} : vector<1x152xf32> to vector<1x10xf32>
    %14 = vector.extract_strided_slice %10 {offsets = [0, 120], sizes = [1, 10], strides = [1, 1]} : vector<1x152xf32> to vector<1x10xf32>
    %15 = vector.extract_strided_slice %10 {offsets = [0, 130], sizes = [1, 10], strides = [1, 1]} : vector<1x152xf32> to vector<1x10xf32>
    %16 = vector.extract_strided_slice %10 {offsets = [0, 140], sizes = [1, 10], strides = [1, 1]} : vector<1x152xf32> to vector<1x10xf32>
    %17 = vector.extract_strided_slice %10 {offsets = [0, 150], sizes = [1, 2], strides = [1, 1]} : vector<1x152xf32> to vector<1x2xf32>
    %c0_13 = arith.constant 0 : index
    %c0_14 = arith.constant 0 : index
    %18 = vector.load %arg1[%c0_13, %c0_14] : memref<2x1xf32, #tpu.memory_space<vmem>>, vector<2x1xf32>
    %19 = vector.broadcast %18 : vector<2x1xf32> to vector<2x10xf32>
    %20 = vector.broadcast %12 : vector<1x10xf32> to vector<2x10xf32>
    %21 = arith.mulf %19, %20 : vector<2x10xf32>
    %22 = vector.broadcast %13 : vector<1x10xf32> to vector<2x10xf32>
    %23 = arith.addf %21, %22 : vector<2x10xf32>
    %cst_15 = arith.constant 0.000000e+00 : f32
    %24 = vector.broadcast %cst_15 : f32 to vector<2x10xf32>
    %25 = arith.maximumf %23, %24 : vector<2x10xf32>
    %26 = vector.extract_strided_slice %10 {offsets = [0, 20], sizes = [1, 10], strides = [1, 1]} : vector<1x152xf32> to vector<1x10xf32>
    %27 = vector.broadcast %26 : vector<1x10xf32> to vector<2x10xf32>
    %28 = arith.mulf %25, %27 : vector<2x10xf32>
    %cst_16 = arith.constant dense<0.000000e+00> : vector<2xf32>
    %29 = vector.multi_reduction <add>, %28, %cst_16 [1] : vector<2x10xf32> to vector<2xf32>
    %30 = vector.shape_cast %29 : vector<2xf32> to vector<2x1xf32>
    %31 = vector.extract_strided_slice %10 {offsets = [0, 30], sizes = [1, 10], strides = [1, 1]} : vector<1x152xf32> to vector<1x10xf32>
    %32 = vector.broadcast %31 : vector<1x10xf32> to vector<2x10xf32>
    %33 = arith.mulf %25, %32 : vector<2x10xf32>
    %cst_17 = arith.constant dense<0.000000e+00> : vector<2xf32>
    %34 = vector.multi_reduction <add>, %33, %cst_17 [1] : vector<2x10xf32> to vector<2xf32>
    %35 = vector.shape_cast %34 : vector<2xf32> to vector<2x1xf32>
    %36 = vector.extract_strided_slice %10 {offsets = [0, 40], sizes = [1, 10], strides = [1, 1]} : vector<1x152xf32> to vector<1x10xf32>
    %37 = vector.broadcast %36 : vector<1x10xf32> to vector<2x10xf32>
    %38 = arith.mulf %25, %37 : vector<2x10xf32>
    %cst_18 = arith.constant dense<0.000000e+00> : vector<2xf32>
    %39 = vector.multi_reduction <add>, %38, %cst_18 [1] : vector<2x10xf32> to vector<2xf32>
    %40 = vector.shape_cast %39 : vector<2xf32> to vector<2x1xf32>
    %41 = vector.extract_strided_slice %10 {offsets = [0, 50], sizes = [1, 10], strides = [1, 1]} : vector<1x152xf32> to vector<1x10xf32>
    %42 = vector.broadcast %41 : vector<1x10xf32> to vector<2x10xf32>
    %43 = arith.mulf %25, %42 : vector<2x10xf32>
    %cst_19 = arith.constant dense<0.000000e+00> : vector<2xf32>
    %44 = vector.multi_reduction <add>, %43, %cst_19 [1] : vector<2x10xf32> to vector<2xf32>
    %45 = vector.shape_cast %44 : vector<2xf32> to vector<2x1xf32>
    %46 = vector.extract_strided_slice %10 {offsets = [0, 60], sizes = [1, 10], strides = [1, 1]} : vector<1x152xf32> to vector<1x10xf32>
    %47 = vector.broadcast %46 : vector<1x10xf32> to vector<2x10xf32>
    %48 = arith.mulf %25, %47 : vector<2x10xf32>
    %cst_20 = arith.constant dense<0.000000e+00> : vector<2xf32>
    %49 = vector.multi_reduction <add>, %48, %cst_20 [1] : vector<2x10xf32> to vector<2xf32>
    %50 = vector.shape_cast %49 : vector<2xf32> to vector<2x1xf32>
    %51 = vector.extract_strided_slice %10 {offsets = [0, 70], sizes = [1, 10], strides = [1, 1]} : vector<1x152xf32> to vector<1x10xf32>
    %52 = vector.broadcast %51 : vector<1x10xf32> to vector<2x10xf32>
    %53 = arith.mulf %25, %52 : vector<2x10xf32>
    %cst_21 = arith.constant dense<0.000000e+00> : vector<2xf32>
    %54 = vector.multi_reduction <add>, %53, %cst_21 [1] : vector<2x10xf32> to vector<2xf32>
    %55 = vector.shape_cast %54 : vector<2xf32> to vector<2x1xf32>
    %56 = vector.extract_strided_slice %10 {offsets = [0, 80], sizes = [1, 10], strides = [1, 1]} : vector<1x152xf32> to vector<1x10xf32>
    %57 = vector.broadcast %56 : vector<1x10xf32> to vector<2x10xf32>
    %58 = arith.mulf %25, %57 : vector<2x10xf32>
    %cst_22 = arith.constant dense<0.000000e+00> : vector<2xf32>
    %59 = vector.multi_reduction <add>, %58, %cst_22 [1] : vector<2x10xf32> to vector<2xf32>
    %60 = vector.shape_cast %59 : vector<2xf32> to vector<2x1xf32>
    %61 = vector.extract_strided_slice %10 {offsets = [0, 90], sizes = [1, 10], strides = [1, 1]} : vector<1x152xf32> to vector<1x10xf32>
    %62 = vector.broadcast %61 : vector<1x10xf32> to vector<2x10xf32>
    %63 = arith.mulf %25, %62 : vector<2x10xf32>
    %cst_23 = arith.constant dense<0.000000e+00> : vector<2xf32>
    %64 = vector.multi_reduction <add>, %63, %cst_23 [1] : vector<2x10xf32> to vector<2xf32>
    %65 = vector.shape_cast %64 : vector<2xf32> to vector<2x1xf32>
    %66 = vector.extract_strided_slice %10 {offsets = [0, 100], sizes = [1, 10], strides = [1, 1]} : vector<1x152xf32> to vector<1x10xf32>
    %67 = vector.broadcast %66 : vector<1x10xf32> to vector<2x10xf32>
    %68 = arith.mulf %25, %67 : vector<2x10xf32>
    %cst_24 = arith.constant dense<0.000000e+00> : vector<2xf32>
    %69 = vector.multi_reduction <add>, %68, %cst_24 [1] : vector<2x10xf32> to vector<2xf32>
    %70 = vector.shape_cast %69 : vector<2xf32> to vector<2x1xf32>
    %71 = vector.extract_strided_slice %10 {offsets = [0, 110], sizes = [1, 10], strides = [1, 1]} : vector<1x152xf32> to vector<1x10xf32>
    %72 = vector.broadcast %71 : vector<1x10xf32> to vector<2x10xf32>
    %73 = arith.mulf %25, %72 : vector<2x10xf32>
    %cst_25 = arith.constant dense<0.000000e+00> : vector<2xf32>
    %74 = vector.multi_reduction <add>, %73, %cst_25 [1] : vector<2x10xf32> to vector<2xf32>
    %75 = vector.shape_cast %74 : vector<2xf32> to vector<2x1xf32>
    %76 = tpu.iota {dimensions = array<i32: 1>} : vector<1x10xi32>
    %c0_i32 = arith.constant 0 : i32
    %77 = vector.broadcast %c0_i32 : i32 to vector<1x10xi32>
    %78 = arith.cmpi eq, %76, %77 : vector<1x10xi32>
    %cst_26 = arith.constant 0.000000e+00 : f32
    %79 = vector.shape_cast %78 : vector<1x10xi1> to vector<1x10xi1>
    %80 = vector.broadcast %79 : vector<1x10xi1> to vector<2x10xi1>
    %81 = vector.shape_cast %30 : vector<2x1xf32> to vector<2x1xf32>
    %82 = vector.broadcast %81 : vector<2x1xf32> to vector<2x10xf32>
    %83 = vector.broadcast %cst_26 : f32 to vector<2x10xf32>
    %84 = arith.select %80, %82, %83 : vector<2x10xi1>, vector<2x10xf32>
    %c1_i32 = arith.constant 1 : i32
    %85 = vector.broadcast %c1_i32 : i32 to vector<1x10xi32>
    %86 = arith.cmpi eq, %76, %85 : vector<1x10xi32>
    %cst_27 = arith.constant 0.000000e+00 : f32
    %87 = vector.shape_cast %86 : vector<1x10xi1> to vector<1x10xi1>
    %88 = vector.broadcast %87 : vector<1x10xi1> to vector<2x10xi1>
    %89 = vector.shape_cast %35 : vector<2x1xf32> to vector<2x1xf32>
    %90 = vector.broadcast %89 : vector<2x1xf32> to vector<2x10xf32>
    %91 = vector.broadcast %cst_27 : f32 to vector<2x10xf32>
    %92 = arith.select %88, %90, %91 : vector<2x10xi1>, vector<2x10xf32>
    %93 = arith.addf %84, %92 : vector<2x10xf32>
    %c2_i32 = arith.constant 2 : i32
    %94 = vector.broadcast %c2_i32 : i32 to vector<1x10xi32>
    %95 = arith.cmpi eq, %76, %94 : vector<1x10xi32>
    %cst_28 = arith.constant 0.000000e+00 : f32
    %96 = vector.shape_cast %95 : vector<1x10xi1> to vector<1x10xi1>
    %97 = vector.broadcast %96 : vector<1x10xi1> to vector<2x10xi1>
    %98 = vector.shape_cast %40 : vector<2x1xf32> to vector<2x1xf32>
    %99 = vector.broadcast %98 : vector<2x1xf32> to vector<2x10xf32>
    %100 = vector.broadcast %cst_28 : f32 to vector<2x10xf32>
    %101 = arith.select %97, %99, %100 : vector<2x10xi1>, vector<2x10xf32>
    %102 = arith.addf %93, %101 : vector<2x10xf32>
    %c3_i32 = arith.constant 3 : i32
    %103 = vector.broadcast %c3_i32 : i32 to vector<1x10xi32>
    %104 = arith.cmpi eq, %76, %103 : vector<1x10xi32>
    %cst_29 = arith.constant 0.000000e+00 : f32
    %105 = vector.shape_cast %104 : vector<1x10xi1> to vector<1x10xi1>
    %106 = vector.broadcast %105 : vector<1x10xi1> to vector<2x10xi1>
    %107 = vector.shape_cast %45 : vector<2x1xf32> to vector<2x1xf32>
    %108 = vector.broadcast %107 : vector<2x1xf32> to vector<2x10xf32>
    %109 = vector.broadcast %cst_29 : f32 to vector<2x10xf32>
    %110 = arith.select %106, %108, %109 : vector<2x10xi1>, vector<2x10xf32>
    %111 = arith.addf %102, %110 : vector<2x10xf32>
    %c4_i32 = arith.constant 4 : i32
    %112 = vector.broadcast %c4_i32 : i32 to vector<1x10xi32>
    %113 = arith.cmpi eq, %76, %112 : vector<1x10xi32>
    %cst_30 = arith.constant 0.000000e+00 : f32
    %114 = vector.shape_cast %113 : vector<1x10xi1> to vector<1x10xi1>
    %115 = vector.broadcast %114 : vector<1x10xi1> to vector<2x10xi1>
    %116 = vector.shape_cast %50 : vector<2x1xf32> to vector<2x1xf32>
    %117 = vector.broadcast %116 : vector<2x1xf32> to vector<2x10xf32>
    %118 = vector.broadcast %cst_30 : f32 to vector<2x10xf32>
    %119 = arith.select %115, %117, %118 : vector<2x10xi1>, vector<2x10xf32>
    %120 = arith.addf %111, %119 : vector<2x10xf32>
    %c5_i32 = arith.constant 5 : i32
    %121 = vector.broadcast %c5_i32 : i32 to vector<1x10xi32>
    %122 = arith.cmpi eq, %76, %121 : vector<1x10xi32>
    %cst_31 = arith.constant 0.000000e+00 : f32
    %123 = vector.shape_cast %122 : vector<1x10xi1> to vector<1x10xi1>
    %124 = vector.broadcast %123 : vector<1x10xi1> to vector<2x10xi1>
    %125 = vector.shape_cast %55 : vector<2x1xf32> to vector<2x1xf32>
    %126 = vector.broadcast %125 : vector<2x1xf32> to vector<2x10xf32>
    %127 = vector.broadcast %cst_31 : f32 to vector<2x10xf32>
    %128 = arith.select %124, %126, %127 : vector<2x10xi1>, vector<2x10xf32>
    %129 = arith.addf %120, %128 : vector<2x10xf32>
    %c6_i32 = arith.constant 6 : i32
    %130 = vector.broadcast %c6_i32 : i32 to vector<1x10xi32>
    %131 = arith.cmpi eq, %76, %130 : vector<1x10xi32>
    %cst_32 = arith.constant 0.000000e+00 : f32
    %132 = vector.shape_cast %131 : vector<1x10xi1> to vector<1x10xi1>
    %133 = vector.broadcast %132 : vector<1x10xi1> to vector<2x10xi1>
    %134 = vector.shape_cast %60 : vector<2x1xf32> to vector<2x1xf32>
    %135 = vector.broadcast %134 : vector<2x1xf32> to vector<2x10xf32>
    %136 = vector.broadcast %cst_32 : f32 to vector<2x10xf32>
    %137 = arith.select %133, %135, %136 : vector<2x10xi1>, vector<2x10xf32>
    %138 = arith.addf %129, %137 : vector<2x10xf32>
    %c7_i32 = arith.constant 7 : i32
    %139 = vector.broadcast %c7_i32 : i32 to vector<1x10xi32>
    %140 = arith.cmpi eq, %76, %139 : vector<1x10xi32>
    %cst_33 = arith.constant 0.000000e+00 : f32
    %141 = vector.shape_cast %140 : vector<1x10xi1> to vector<1x10xi1>
    %142 = vector.broadcast %141 : vector<1x10xi1> to vector<2x10xi1>
    %143 = vector.shape_cast %65 : vector<2x1xf32> to vector<2x1xf32>
    %144 = vector.broadcast %143 : vector<2x1xf32> to vector<2x10xf32>
    %145 = vector.broadcast %cst_33 : f32 to vector<2x10xf32>
    %146 = arith.select %142, %144, %145 : vector<2x10xi1>, vector<2x10xf32>
    %147 = arith.addf %138, %146 : vector<2x10xf32>
    %c8_i32 = arith.constant 8 : i32
    %148 = vector.broadcast %c8_i32 : i32 to vector<1x10xi32>
    %149 = arith.cmpi eq, %76, %148 : vector<1x10xi32>
    %cst_34 = arith.constant 0.000000e+00 : f32
    %150 = vector.shape_cast %149 : vector<1x10xi1> to vector<1x10xi1>
    %151 = vector.broadcast %150 : vector<1x10xi1> to vector<2x10xi1>
    %152 = vector.shape_cast %70 : vector<2x1xf32> to vector<2x1xf32>
    %153 = vector.broadcast %152 : vector<2x1xf32> to vector<2x10xf32>
    %154 = vector.broadcast %cst_34 : f32 to vector<2x10xf32>
    %155 = arith.select %151, %153, %154 : vector<2x10xi1>, vector<2x10xf32>
    %156 = arith.addf %147, %155 : vector<2x10xf32>
    %c9_i32 = arith.constant 9 : i32
    %157 = vector.broadcast %c9_i32 : i32 to vector<1x10xi32>
    %158 = arith.cmpi eq, %76, %157 : vector<1x10xi32>
    %cst_35 = arith.constant 0.000000e+00 : f32
    %159 = vector.shape_cast %158 : vector<1x10xi1> to vector<1x10xi1>
    %160 = vector.broadcast %159 : vector<1x10xi1> to vector<2x10xi1>
    %161 = vector.shape_cast %75 : vector<2x1xf32> to vector<2x1xf32>
    %162 = vector.broadcast %161 : vector<2x1xf32> to vector<2x10xf32>
    %163 = vector.broadcast %cst_35 : f32 to vector<2x10xf32>
    %164 = arith.select %160, %162, %163 : vector<2x10xi1>, vector<2x10xf32>
    %165 = arith.addf %156, %164 : vector<2x10xf32>
    %166 = vector.broadcast %14 : vector<1x10xf32> to vector<2x10xf32>
    %167 = arith.addf %165, %166 : vector<2x10xf32>
    %cst_36 = arith.constant 0.000000e+00 : f32
    %168 = vector.broadcast %cst_36 : f32 to vector<2x10xf32>
    %169 = arith.maximumf %167, %168 : vector<2x10xf32>
    %170 = vector.broadcast %15 : vector<1x10xf32> to vector<2x10xf32>
    %171 = arith.mulf %169, %170 : vector<2x10xf32>
    %cst_37 = arith.constant dense<0.000000e+00> : vector<2xf32>
    %172 = vector.multi_reduction <add>, %171, %cst_37 [1] : vector<2x10xf32> to vector<2xf32>
    %173 = vector.shape_cast %172 : vector<2xf32> to vector<2x1xf32>
    %174 = vector.broadcast %16 : vector<1x10xf32> to vector<2x10xf32>
    %175 = arith.mulf %169, %174 : vector<2x10xf32>
    %cst_38 = arith.constant dense<0.000000e+00> : vector<2xf32>
    %176 = vector.multi_reduction <add>, %175, %cst_38 [1] : vector<2x10xf32> to vector<2xf32>
    %177 = vector.shape_cast %176 : vector<2xf32> to vector<2x1xf32>
    %178 = tpu.iota {dimensions = array<i32: 1>} : vector<1x2xi32>
    %c0_i32_39 = arith.constant 0 : i32
    %179 = vector.broadcast %c0_i32_39 : i32 to vector<1x2xi32>
    %180 = arith.cmpi eq, %178, %179 : vector<1x2xi32>
    %cst_40 = arith.constant 0.000000e+00 : f32
    %181 = vector.shape_cast %180 : vector<1x2xi1> to vector<1x2xi1>
    %182 = vector.broadcast %181 : vector<1x2xi1> to vector<2x2xi1>
    %183 = vector.shape_cast %173 : vector<2x1xf32> to vector<2x1xf32>
    %184 = vector.broadcast %183 : vector<2x1xf32> to vector<2x2xf32>
    %185 = vector.broadcast %cst_40 : f32 to vector<2x2xf32>
    %186 = arith.select %182, %184, %185 : vector<2x2xi1>, vector<2x2xf32>
    %c1_i32_41 = arith.constant 1 : i32
    %187 = vector.broadcast %c1_i32_41 : i32 to vector<1x2xi32>
    %188 = arith.cmpi eq, %178, %187 : vector<1x2xi32>
    %cst_42 = arith.constant 0.000000e+00 : f32
    %189 = vector.shape_cast %188 : vector<1x2xi1> to vector<1x2xi1>
    %190 = vector.broadcast %189 : vector<1x2xi1> to vector<2x2xi1>
    %191 = vector.shape_cast %177 : vector<2x1xf32> to vector<2x1xf32>
    %192 = vector.broadcast %191 : vector<2x1xf32> to vector<2x2xf32>
    %193 = vector.broadcast %cst_42 : f32 to vector<2x2xf32>
    %194 = arith.select %190, %192, %193 : vector<2x2xi1>, vector<2x2xf32>
    %195 = arith.addf %186, %194 : vector<2x2xf32>
    %196 = vector.broadcast %17 : vector<1x2xf32> to vector<2x2xf32>
    %197 = arith.addf %195, %196 : vector<2x2xf32>
    %c0_43 = arith.constant 0 : index
    %c0_44 = arith.constant 0 : index
    %198 = vector.load %arg6[%c0_43, %c0_44] : memref<2x2xf32, #tpu.memory_space<vmem>>, vector<2x2xf32>
    tpu.vector_store %arg6[%c0_43, %c0_44], %197 {strides = array<i32>} : memref<2x2xf32, #tpu.memory_space<vmem>>, vector<2x2xf32>,
    return
  }
}

</mosaic_0001>

<bundles_post_ra>
// kernel: hypernetwork_forward.1
= control target key start
LH: loop header
LB: loop body
LE: loop exit
PB: predicated region body
PF: predicated region fallthrough
CT: control target
= control target key end

     0   :  { %13 = vsyncpa [#allocation3], 0  ;;  %s653_s0 = inlined_call_operand.vmem [shape: f32[1,32], index: 0, kind: input, shape index: {}]   ;;  %s654_s1 = inlined_call_operand.vmem [shape: f32[2,1], index: 1, kind: input, shape index: {}]   ;;  %s655_s2 = inlined_call_operand.hbm [shape: f32[32,64], index: 2, kind: input, shape index: {}]   ;;  %s656_s3 = inlined_call_operand.hbm [shape: f32[1,64], index: 3, kind: input, shape index: {}]   ;;  %s657_s4 = inlined_call_operand.hbm [shape: f32[64,152], index: 4, kind: input, shape index: {}]   ;;  %s658_s5 = inlined_call_operand.vmem [shape: f32[1,152], index: 5, kind: input, shape index: {}]   ;;  %s659_s6 = inlined_call_operand.hbm [shape: f32[2,2], index: 6, kind: output, shape index: {0}]   ;;  %s660_s7 = inlined_call_operand.hbm [shape: f32[1,152], index: 7, kind: output, shape index: {1}]  }
   0x1   :  { %14 = vsyncpa [#allocation6], 0 }
   0x2   :  { %15 = vsyncpa [#allocation4], 0  ;;  %s39_s26 = sshll.u32 %s656_s3, 4  ;;  %s40_s26 = int_to_ptr.hbm [resolvable:$true] %s39_s26 }
   0x3   :  { %16 = vsyncpa [#allocation10], 0  ;;  %s540_s27 = smov [#allocation5]   ;;  %s25_s8 = sshll.u32 %s655_s2, 4  ;;  %s26_s8 = int_to_ptr.hbm [resolvable:$true] %s25_s8 }
   0x4   :  { %s41_s28 = sshll.u32 %s540_s27, 4  ;;  %s541_s9 = smov [#allocation2]   ;;  %s42_s28 = int_to_ptr.vmem [resolvable:$true] %s41_s28 }
   0x5   :  { %44 = dma.hbm_to_vmem [thread:$0]  %s40_s26, 16, %s42_s28, [#allocation6]  }
   0x6   :  { %s27_s10 = sshll.u32 %s541_s9, 4  ;;  %s542_s11 = smov 128   ;;  %s28_s10 = int_to_ptr.vmem [resolvable:$true] %s27_s10 }
   0x7   :  { %s543_s12 = smov 8   ;;  %s49_s14 = sshll.u32 %s657_s4, 4  ;;  %s50_s14 = int_to_ptr.hbm [resolvable:$true] %s49_s14 }
   0x8   :  { %33 = dma.hbm_to_vmem [thread:$0]  %s26_s8, 512, %s28_s10, [#allocation3], %s542_s11, %s542_s11, %s543_s12  }
   0x9   :  { %s544_s15 = smov [#allocation7]   ;;  %s545_s17 = smov 256  }
   0xa   :  { %s51_s16 = sshll.u32 %s544_s15, 4  ;;  %s546_s18 = smov 16   ;;  %s52_s16 = int_to_ptr.vmem [resolvable:$true] %s51_s16 }
   0xb   :  { %57 = dma.hbm_to_vmem [thread:$0]  %s50_s14, 2048, %s52_s16, [#allocation6], %s545_s17, %s545_s17, %s546_s18  }
   0xc   :  { %532 = dma.done.wait [#allocation3], 512  }
   0xd   :  { %533 = vsyncadd [#allocation3], 4294966784 }
   0xe   :  { %534 = dma.done.wait [#allocation6], 2064  }
   0xf   :  { %535 = vsyncadd [#allocation6], 4294965232  ;;  %v76_v0 = vld [vmem:[#allocation2 + $0x18] sm:$0xff]  ;;  %v75_v1 = vld [vmem:[#allocation2 + $0x10] sm:$0xff]  ;;  %vm78_vm0 = vcmask 261120   ;;  %v547_v22 = vmov 0   ;;  %v175_v33 = vlaneseq }
  0x10   :  { %94 = vmatpush.msra.mxu0 %v76_v0  ;;  %v74_v2 = vld [vmem:[#allocation2 + $0x8] sm:$0xff]  ;;  %v117_v3 = vld [vmem:[#allocation7 + $0x70] sm:$0xff]  ;;  %v118_v4 = vld [vmem:[#allocation7 + $0x78] sm:$0xff]  ;;  %411 = vset.pattern.permute.xlu0 %v547_v22  ;;  %vm125_vm1 = vcmask 523264   ;;  %s549_s22 = smov 108   ;;  %s550_s23 = smov 118  }
  0x11   :  { %137 = vmatpush.msra.mxu1 %v117_v3  ;;  %v115_v5 = vld [vmem:[#allocation7 + $0x60] sm:$0xff]  ;;  %v116_v6 = vld [vmem:[#allocation7 + $0x68] sm:$0xff]  ;;  %157 = vmatpush.msra.mxu2 %v118_v4  ;;  %v113_v7 = vld [vmem:[#allocation7 + $0x50] sm:$0xff]  ;;  %vm172_vm2 = vcmask 1040384   ;;  %vm177_vm3 = vcmp.lt.s32.totalorder %v175_v33, 152  ;;  %s552_s24 = smov 68  }
  0x12   :  { %95 = vmatpush.msra.mxu0 %v75_v1  ;;  %v73_v8 = vld [vmem:[#allocation2] sm:$0xff]  ;;  %v112_v12 = vld [vmem:[#allocation7 + $0x48] sm:$0xff]  ;;  %v109_v13 = vld [vmem:[#allocation7 + $0x30] sm:$0xff]  ;;  %s553_s25 = smov 88   ;;  %s554_s26 = smov 58   ;;  %vm198_vm4 = vcmask 74752  }
  0x13   :  { %138 = vmatpush.msra.mxu1 %v115_v5  ;;  %v114_v9 = vld [vmem:[#allocation7 + $0x58] sm:$0xff]  ;;  %158 = vmatpush.msra.mxu2 %v116_v6  ;;  %v111_v11 = vld [vmem:[#allocation7 + $0x40] sm:$0xff]  ;;  %v108_v16 = vld [vmem:[#allocation7 + $0x28] sm:$0xff]  ;;  %s555_s27 = smov 28   ;;  %s556_s28 = smov 38   ;;  %vm322_vm15 = vcmask 64512  }
  0x14   :  { %96 = vmatpush.msra.mxu0 %v74_v2  ;;  %v72_v10 = vld [vmem:[%s653_s0] sm:$0x1]  ;;  %v107_v15 = vld [vmem:[#allocation7 + $0x20] sm:$0xff]  ;;  %v105_v17 = vld [vmem:[#allocation7 + $0x10] sm:$0xff]  ;;  %s557_s29 = smov 48   ;;  %s558_s30 = smov 18  }
  0x15   :  { %139 = vmatpush.msra.mxu1 %v113_v7  ;;  %159 = vmatpush.msra.mxu2 %v114_v9  ;;  %v110_v14 = vld [vmem:[#allocation7 + $0x38] sm:$0xff]  ;;  %v103_v19 = vld [vmem:[#allocation7] sm:$0xff]  ;;  %v104_v20 = vld [vmem:[#allocation7 + $0x8] sm:$0xff]  ;;  %s559_s8 = smov 116   ;;  %s560_s9 = smov 106  }
  0x16   :  { %97 = vmatpush.msra.mxu0 %v73_v8  ;;  %v106_v18 = vld [vmem:[#allocation7 + $0x18] sm:$0xff]  ;;  %s561_s10 = smov 126   ;;  %s562_s11 = smov [#allocation9]  }
  0x17   :  { %384 = vmatmul.msk.f32.vlgmr.msra.gmra.mxu0 %vm78_vm0, %v72_v10  ;;  %140 = vmatpush.msra.mxu1 %v111_v11  ;;  %v180_v21 = vld [vmem:[%s654_s1] sm:$0x3]  ;;  %s548_s1 = smov 98   ;;  %s368_s14 = sshll.u32 %s660_s7, 4  ;;  %vm348_vm0 = vcmask 9216   ;;  %s369_s14 = int_to_ptr.hbm [resolvable:$true] %s368_s14 }
  0x18   :  { %160 = vmatpush.msra.mxu2 %v112_v12  ;;  %183 = vperm.xlu0 %411, %v180_v21   ;;  %v77_v23 = vld [vmem:[#allocation5] sm:$0x1]  ;;  %s563_s7 = smov [#allocation8]   ;;  %s357_s18 = sshll.u32 %s659_s6, 4  ;;  %s358_s18 = int_to_ptr.hbm [resolvable:$true] %s357_s18 }
  0x19   :  { %141 = vmatpush.msra.mxu1 %v109_v13  ;;  %v119_v27 = vld [vmem:[%s658_s5] sm:$0x3]  ;;  %s551_s5 = smov 78   ;;  %v266_v13 = vand.u32 127, %v175_v33  ;;  %s355_s15 = sshll.u32 %s563_s7, 4  ;;  %s356_s15 = int_to_ptr.vmem [resolvable:$true] %s355_s15 }
  0x1a   :  { %161 = vmatpush.msra.mxu2 %v110_v14  ;;  %v121_v28 = vperm.slane %v119_v27, 0  ;;  %v122_v32 = vperm.slane %v119_v27, 1 }
  0x1b   :  { %142 = vmatpush.msra.mxu1 %v107_v15  ;;  %vm271_vm5 = vcmp.eq.s32.totalorder %v266_v13, 1  ;;  %vm267_vm6 = vcmp.eq.s32.totalorder %v266_v13, 0  ;;  %vm276_vm7 = vcmp.eq.s32.totalorder %v266_v13, 2  ;;  %vm281_vm8 = vcmp.eq.s32.totalorder %v266_v13, 3 }
  0x1c   :  { %162 = vmatpush.msra.mxu2 %v108_v16  ;;  %vm286_vm9 = vcmp.eq.s32.totalorder %v266_v13, 4  ;;  %vm291_vm10 = vcmp.eq.s32.totalorder %v266_v13, 5  ;;  %vm296_vm11 = vcmp.eq.s32.totalorder %v266_v13, 6  ;;  %vm301_vm12 = vcmp.eq.s32.totalorder %v266_v13, 7 }
  0x1d   :  { %143 = vmatpush.msra.mxu1 %v105_v17  ;;  %vm306_vm13 = vcmp.eq.s32.totalorder %v266_v13, 8  ;;  %vm311_vm14 = vcmp.eq.s32.totalorder %v266_v13, 9 }
  0x1e   :  { %163 = vmatpush.msra.mxu2 %v106_v18 }
  0x1f   :  { %144 = vmatpush.msra.mxu1 %v103_v19 }
  0x20   :  { %164 = vmatpush.msra.mxu2 %v104_v20 }
  0x8a   :  { %v184_v39 = vpop.permute.xlu0 %183 }
  0x94   :  { %v99_v24 = vpop.f32.mrf.mxu0 }
  0x95   :  { %v100_v25 = vadd.f32 %v99_v24, %v77_v23 }
  0x97   :  { %v102_v26 = vmax.f32 %v100_v25, 0.0 }
  0x99   :  { %385 = vmatmul.msk.f32.vlgmr.msra.gmra.mxu1 %vm125_vm1, %v102_v26  ;;  %386 = vmatmul.msk.f32.vlgmr.msra.gmra.mxu2 %vm125_vm1, %v102_v26 }
 0x116   :  { %v146_v29 = vpop.f32.mrf.mxu1 }
 0x117   :  { %v147_v30 = vadd.f32 %v146_v29, %v121_v28 }
 0x119   :  { %v186_v31 = vperm.slane %v147_v30, 0 }
 0x11b   :  { %202 = vrot.lane.b32.xlu2 %v186_v31, %s548_s1  ;;  %194 = vrot.lane.b32.xlu1 %v186_v31, %s549_s22  ;;  %v187_v41 = vmul.f32 %v186_v31, %v184_v39 }
 0x11c   :  { %189 = vrot.lane.b32.xlu0 %v186_v31, %s550_s23  ;;  %v166_v34 = vpop.f32.mrf.mxu2 }
 0x11d   :  { %v623_v35 = vadd.f32 %v166_v34, %v122_v32 }
 0x11f   :  { %v171_v36 = vrot.slane %v623_v35, 7  ;;  %v316_v9 = vperm.slane %v623_v35, 0 }
 0x121   :  { %v173_v37 = vsel %vm172_vm2, %v147_v30, %v171_v36 }
 0x122   :  { %179 = vst.msk [vmem:[#allocation9] sm:$0x3] %vm177_vm3, %v173_v37 }
 0x123   :  { %216 = vrot.lane.b32.xlu2 %v186_v31, %s551_s5  ;;  %223 = vrot.lane.b32.xlu1 %v186_v31, %s552_s24 }
 0x124   :  { %209 = vrot.lane.b32.xlu0 %v186_v31, %s553_s25 }
 0x12b   :  { %230 = vrot.lane.b32.xlu2 %v186_v31, %s554_s26  ;;  %251 = vrot.lane.b32.xlu1 %v186_v31, %s555_s27 }
 0x12c   :  { %244 = vrot.lane.b32.xlu0 %v186_v31, %s556_s28 }
 0x133   :  { %237 = vrot.lane.b32.xlu2 %v186_v31, %s557_s29 }
 0x13b   :  { %258 = vrot.lane.b32.xlu2 %v186_v31, %s558_s30 }
 0x143   :  { %318 = vrot.lane.b32.xlu2 %v186_v31, %s543_s12 }
 0x175   :  { %v203_v38 = vpop.permute.xlu2 %202 }
 0x17d   :  { %v217_v40 = vpop.permute.xlu2 %216 }
 0x185   :  { %v231_v46 = vpop.permute.xlu2 %230 }
 0x18d   :  { %v195_v44 = vpop.permute.xlu1 %194  ;;  %v238_v56 = vpop.permute.xlu2 %237 }
 0x18e   :  { %v190_v42 = vpop.permute.xlu0 %189 }
 0x18f   :  { %v192_v43 = vadd.f32 %v190_v42, %v187_v41 }
 0x191   :  { %v193_v45 = vmax.f32 %v192_v43, 0.0 }
 0x193   :  { %v205_v47 = vmul.f32 %v203_v38, %v193_v45  ;;  %v197_v48 = vmul.f32 %v195_v44, %v193_v45  ;;  %v219_v54 = vmul.f32 %v217_v40, %v193_v45  ;;  %v240_v63 = vmul.f32 %v238_v56, %v193_v45 }
 0x194   :  { %v233_v1 = vmul.f32 %v231_v46, %v193_v45 }
 0x195   :  { %v206_v49 = vsel %vm198_vm4, %v205_v47, 0.0  ;;  %v199_v50 = vsel %vm198_vm4, %v197_v48, 0.0  ;;  %v224_v55 = vpop.permute.xlu1 %223  ;;  %v220_v58 = vsel %vm198_vm4, %v219_v54, 0.0  ;;  %v241_v0 = vsel %vm198_vm4, %v240_v63, 0.0  ;;  %v259_v2 = vpop.permute.xlu2 %258 }
 0x196   :  { %v210_v51 = vpop.permute.xlu0 %209  ;;  %207 = vadd.xlane.f32.xlu2 %v206_v49  ;;  %200 = vadd.xlane.f32.xlu1 %v199_v50  ;;  %v226_v57 = vmul.f32 %v224_v55, %v193_v45  ;;  %v261_v3 = vmul.f32 %v259_v2, %v193_v45  ;;  %v234_v4 = vsel %vm198_vm4, %v233_v1, 0.0 }
 0x197   :  { %v212_v52 = vmul.f32 %v210_v51, %v193_v45 }
 0x198   :  { %v227_v61 = vsel %vm198_vm4, %v226_v57, 0.0  ;;  %v262_v7 = vsel %vm198_vm4, %v261_v3, 0.0 }
 0x199   :  { %v213_v53 = vsel %vm198_vm4, %v212_v52, 0.0 }
 0x19a   :  { %214 = vadd.xlane.f32.xlu0 %v213_v53 }
 0x19d   :  { %v252_v5 = vpop.permute.xlu1 %251  ;;  %v319_v12 = vpop.permute.xlu2 %318 }
 0x19e   :  { %v245_v59 = vpop.permute.xlu0 %244  ;;  %221 = vadd.xlane.f32.xlu1 %v220_v58  ;;  %v254_v6 = vmul.f32 %v252_v5, %v193_v45 }
 0x19f   :  { %v247_v60 = vmul.f32 %v245_v59, %v193_v45 }
 0x1a0   :  { %v255_v8 = vsel %vm198_vm4, %v254_v6, 0.0 }
 0x1a1   :  { %v248_v62 = vsel %vm198_vm4, %v247_v60, 0.0 }
 0x1a2   :  { %228 = vadd.xlane.f32.xlu0 %v227_v61  ;;  %249 = vadd.xlane.f32.xlu2 %v248_v62 }
 0x1a6   :  { %242 = vadd.xlane.f32.xlu1 %v241_v0 }
 0x1aa   :  { %235 = vadd.xlane.f32.xlu0 %v234_v4 }
 0x1ae   :  { %263 = vadd.xlane.f32.xlu1 %v262_v7 }
 0x1b2   :  { %256 = vadd.xlane.f32.xlu0 %v255_v8 }
 0x1ba   :  { %334 = vrot.lane.b32.xlu2 %v316_v9, %s559_s8 }
 0x1c2   :  { %344 = vrot.lane.b32.xlu2 %v316_v9, %s560_s9 }
 0x1c6   :  { %327 = vrot.lane.b32.xlu0 %v316_v9, %s561_s10 }
 0x1c7   :  { %320 = vrot.lane.b32.xlu1 %v316_v9, %s543_s12  ;;  %s366_s12 = sshll.u32 %s562_s11, 4  ;;  %s367_s12 = int_to_ptr.vmem [resolvable:$true] %s366_s12 }
 0x1c8   :  { %371 = dma.vmem_to_hbm [thread:$0]  %s367_s12, 32, %s369_s14, [#allocation10]  }
 0x209   :  { %v201_v11 = vpop.xlane.xlu1 %200  ;;  %v208_v15 = vpop.xlane.xlu2 %207 }
 0x20a   :  { %v274_v17 = vsel %vm271_vm5, %v208_v15, 0.0  ;;  %v270_v18 = vsel %vm267_vm6, %v201_v11, 0.0 }
 0x20b   :  { %v275_v20 = vadd.f32 %v274_v17, %v270_v18 }
 0x20d   :  { %v215_v10 = vpop.xlane.xlu0 %214 }
 0x20e   :  { %v279_v19 = vsel %vm276_vm7, %v215_v10, 0.0 }
 0x20f   :  { %v280_v22 = vadd.f32 %v279_v19, %v275_v20 }
 0x211   :  { %v222_v16 = vpop.xlane.xlu1 %221 }
 0x212   :  { %v284_v21 = vsel %vm281_vm8, %v222_v16, 0.0 }
 0x213   :  { %v285_v25 = vadd.f32 %v284_v21, %v280_v22 }
 0x215   :  { %v229_v14 = vpop.xlane.xlu0 %228  ;;  %v250_v31 = vpop.xlane.xlu2 %249 }
 0x216   :  { %v289_v24 = vsel %vm286_vm9, %v229_v14, 0.0  ;;  %v304_v35 = vsel %vm301_vm12, %v250_v31, 0.0 }
 0x217   :  { %v290_v28 = vadd.f32 %v289_v24, %v285_v25 }
 0x219   :  { %v243_v26 = vpop.xlane.xlu1 %242 }
 0x21a   :  { %v299_v30 = vsel %vm296_vm11, %v243_v26, 0.0 }
 0x21d   :  { %v236_v23 = vpop.xlane.xlu0 %235  ;;  %v335_v45 = vpop.permute.xlu2 %334 }
 0x21e   :  { %v294_v27 = vsel %vm291_vm10, %v236_v23, 0.0 }
 0x21f   :  { %v295_v29 = vadd.f32 %v294_v27, %v290_v28 }
 0x221   :  { %v300_v32 = vadd.f32 %v299_v30, %v295_v29  ;;  %v264_v34 = vpop.xlane.xlu1 %263 }
 0x222   :  { %v314_v39 = vsel %vm311_vm14, %v264_v34, 0.0 }
 0x223   :  { %v305_v37 = vadd.f32 %v304_v35, %v300_v32 }
 0x225   :  { %v257_v33 = vpop.xlane.xlu0 %256  ;;  %v345_v56 = vpop.permute.xlu2 %344 }
 0x226   :  { %v309_v36 = vsel %vm306_vm13, %v257_v33, 0.0 }
 0x227   :  { %v310_v38 = vadd.f32 %v309_v36, %v305_v37 }
 0x229   :  { %v315_v40 = vadd.f32 %v314_v39, %v310_v38 }
 0x238   :  { %v328_v46 = vpop.permute.xlu0 %327 }
 0x239   :  { %v321_v41 = vpop.permute.xlu1 %320 }
 0x23a   :  { %v323_v42 = vsel %vm322_vm15, %v319_v12, %v321_v41 }
 0x23b   :  { %v325_v43 = vadd.f32 %v323_v42, %v315_v40 }
 0x23d   :  { %v326_v44 = vmax.f32 %v325_v43, 0.0 }
 0x23f   :  { %v337_v47 = vmul.f32 %v335_v45, %v326_v44  ;;  %v330_v48 = vmul.f32 %v328_v46, %v326_v44 }
 0x241   :  { %v338_v49 = vsel %vm198_vm4, %v337_v47, 0.0  ;;  %v331_v50 = vsel %vm198_vm4, %v330_v48, 0.0 }
 0x242   :  { %339 = vadd.xlane.f32.xlu1 %v338_v49  ;;  %332 = vadd.xlane.f32.xlu0 %v331_v50 }
 0x2b5   :  { %v340_v51 = vpop.xlane.xlu1 %339  ;;  %v333_v52 = vpop.xlane.xlu0 %332 }
 0x2b6   :  { %v342_v53 = vsel %vm271_vm5, %v340_v51, 0.0  ;;  %v341_v54 = vsel %vm267_vm6, %v333_v52, 0.0 }
 0x2b7   :  { %v343_v55 = vadd.f32 %v342_v53, %v341_v54 }
 0x2b9   :  { %v347_v57 = vadd.f32 %v345_v56, %v343_v55 }
 0x2bb   :  { %349 = vst.msk [vmem:[#allocation8] sm:$0x3] %vm348_vm0, %v347_v57 }
 0x2bc   :  { %360 = dma.vmem_to_hbm [thread:$0]  %s356_s15, 32, %s358_s18, [#allocation4]  }
 0x2bd   :  { %536 = dma.done.wait [#allocation4], 32  }
 0x2be   :  { %537 = vsyncadd [#allocation4], 4294967264 }
 0x2bf   :  { %538 = dma.done.wait [#allocation10], 32  }
 0x2c0   :  { %539 = vsyncadd [#allocation10], 4294967264 }
 0x2c1   :  { %380 = vsyncpa [#allocation3], 1 }
 0x2c2   :  { %381 = vsyncpa [#allocation6], 1 }
 0x2c3   :  { %382 = vsyncpa [#allocation4], 1 }
 0x2c4   :  { %383 = vsyncpa [#allocation10], 1 }

</bundles_post_ra>
